<compile_context>
chip_gen: v7x
topology: tpu7x:2x2x1
jax: 0.10.0
libtpu: 0.0.40
codegen_flags: <defaults>
</compile_context>

<pallas_src>
import jax
import jax.numpy as jnp
from jax.experimental import pallas as pl
from jax.experimental.pallas import tpu as pltpu


def _round_up(x: int, m: int) -> int:
    return ((x + m - 1) // m) * m


def _rowtile_matmul_kernel(x_ref, p_ref, o_ref):
    # One (TILE_ROWS, D) x (D, Kp) MXU matmul per grid step; f32 accumulate,
    # cast back to storage precision on store.
    o_ref[...] = jnp.dot(
        x_ref[...], p_ref[...], preferred_element_type=jnp.float32
    ).astype(o_ref.dtype)


def _project_rows(x2d, p_padded, *, tile_rows):
    """Row-tiled `x2d @ p_padded` with P resident in VMEM across row tiles."""
    rows, D = x2d.shape
    Dp, Kp = p_padded.shape
    assert D == Dp
    out_dtype = jnp.promote_types(x2d.dtype, p_padded.dtype)

    # Row tile: keep sublane alignment (16 rows for bf16 packing), don't
    # over-pad tiny inputs, cap at the requested tile for large inputs.
    tr = min(tile_rows, _round_up(rows, 16))
    rows_p = _round_up(rows, tr)
    if rows_p != rows:
        x2d = jnp.pad(x2d, ((0, rows_p - rows), (0, 0)))
    grid = (rows_p // tr,)

    # VMEM budget: double-buffered input/output tiles + resident P (counted
    # double for safety), with 2x headroom, clamped to a sane range.
    in_bytes = 2 * tr * D * x2d.dtype.itemsize
    p_bytes = 2 * Dp * Kp * p_padded.dtype.itemsize
    out_bytes = 2 * tr * Kp * out_dtype.itemsize
    vmem_limit = int(min(max(2 * (in_bytes + p_bytes + out_bytes), 16 << 20),
                         100 << 20))

    cost = pl.CostEstimate(
        flops=2 * rows_p * D * Kp,
        transcendentals=0,
        bytes_accessed=(rows_p * D * x2d.dtype.itemsize
                        + Dp * Kp * p_padded.dtype.itemsize
                        + rows_p * Kp * out_dtype.itemsize),
    )

    out = pl.pallas_call(
        _rowtile_matmul_kernel,
        out_shape=jax.ShapeDtypeStruct((rows_p, Kp), out_dtype),
        grid=grid,
        in_specs=[
            pl.BlockSpec((tr, D), lambda i: (i, 0)),    # streamed row tiles
            pl.BlockSpec((Dp, Kp), lambda i: (0, 0)),   # P: constant index_map -> resident
        ],
        out_specs=pl.BlockSpec((tr, Kp), lambda i: (i, 0)),
        compiler_params=pltpu.CompilerParams(
            dimension_semantics=("parallel",),   # megacore sharding on v7x
            vmem_limit_bytes=vmem_limit,
        ),
        cost_estimate=cost,
    )(x2d, p_padded)
    return out[:rows]


def common_projection_forward(act, weight, projection_matrix, *, tile_rows=512):
    """Pallas forward: (act @ P, weight @ P) with PyTorch matmul broadcasting."""
    D, K = projection_matrix.shape
    assert act.shape[-1] == D and weight.shape[-1] == D

    # Lane-dense outputs: pad K to a multiple of 128 with zero columns and
    # slice the padding off after the kernel (avoids masked vst.msk stores).
    Kp = _round_up(K, 128)
    p_pad = projection_matrix
    if Kp != K:
        p_pad = jnp.pad(projection_matrix, ((0, 0), (0, Kp - K)))

    act_2d = act.reshape(-1, D)
    w_2d = weight.reshape(-1, D)

    # TODO(synk): if `weight` is static across many forward calls (typical for
    # a Linear layer), hoist weight @ P out of the per-step hot path at the
    # caller; it is recomputed here to preserve the module's forward semantics.
    pa = _project_rows(act_2d, p_pad, tile_rows=tile_rows)[:, :K]
    pw = _project_rows(w_2d, p_pad, tile_rows=tile_rows)[:, :K]

    return (pa.reshape(act.shape[:-1] + (K,)),
            pw.reshape(weight.shape[:-1] + (K,)))


def build_projection_matrix(loaded_projection_matrix, scores, num_components, precision):
    """Mirrors initialize_buffers() for the 2-D (non-TP_merging) case with
    projection_method='absolute_eigen'. Plain-JAX setup glue (runs once)."""
    sorted_idx = jnp.argsort(-jnp.abs(scores))            # descending by |score|
    truncated_idx = sorted_idx[:num_components]
    return loaded_projection_matrix[:, truncated_idx].astype(precision)


if __name__ == "__main__":
    # Small deterministic shapes: hidden D=32, keep K=16 components,
    # act [B=2, S=8, D=32], weight [N=64, D=32] (linear weight rows in D).
    key = jax.random.PRNGKey(0)
    k_proj, k_scores, k_act, k_w = jax.random.split(key, 4)

    D, K = 32, 16
    B, S, N = 2, 8, 64
    precision = jnp.bfloat16  # espace_args.precision == 'bf16'

    loaded_projection_matrix = jax.random.normal(k_proj, (D, D), dtype=jnp.float32)
    scores = jax.random.normal(k_scores, (D,), dtype=jnp.float32)
    P = build_projection_matrix(loaded_projection_matrix, scores, K, precision)

    act = jax.random.normal(k_act, (B, S, D), dtype=jnp.float32).astype(precision)
    weight = jax.random.normal(k_w, (N, D), dtype=jnp.float32).astype(precision)

    projected_act, projected_weight = common_projection_forward(act, weight, P)
    jax.block_until_ready(projected_act)
    jax.block_until_ready(projected_weight)

    # Reference check against plain-JAX matmul (same semantics as torch.matmul).
    ref_act = jnp.matmul(act.astype(jnp.float32), P.astype(jnp.float32)).astype(precision)
    ref_w = jnp.matmul(weight.astype(jnp.float32), P.astype(jnp.float32)).astype(precision)
    assert projected_act.shape == (B, S, K) and projected_act.dtype == precision
    assert projected_weight.shape == (N, K) and projected_weight.dtype == precision
    assert jnp.allclose(projected_act.astype(jnp.float32),
                        ref_act.astype(jnp.float32), atol=1e-1, rtol=1e-1)
    assert jnp.allclose(projected_weight.astype(jnp.float32),
                        ref_w.astype(jnp.float32), atol=1e-1, rtol=1e-1)

    print("KERNEL_OK")
</pallas_src>

<mosaic_0001>
module attributes {stable_mosaic.version = 11 : i64} {
  func.func @_rowtile_matmul_kernel(%arg0: i32, %arg1: memref<16x32xbf16, #tpu.memory_space<vmem>>, %arg2: memref<32x128xbf16, #tpu.memory_space<vmem>>, %arg3: memref<16x128xbf16, #tpu.memory_space<vmem>>) attributes {dimension_semantics = [#tpu.dimension_semantics<parallel>], iteration_bounds = array<i64: 1>, scalar_prefetch = 0 : i64, scratch_operands = 0 : i64, tpu.core_type = #tpu.core_type<tc>, window_params = [{transform_indices = @transform_0, window_bounds = array<i64: 16, 32>}, {pipeline_mode = #tpu.pipeline_mode<synchronous>, transform_indices = @transform_1, window_bounds = array<i64: 32, 128>}, {transform_indices = @transform_2, window_bounds = array<i64: 16, 128>}]} {
    %c0 = arith.constant 0 : index
    %c0_0 = arith.constant 0 : index
    %0 = vector.load %arg1[%c0, %c0_0] : memref<16x32xbf16, #tpu.memory_space<vmem>>, vector<16x32xbf16>
    %c0_1 = arith.constant 0 : index
    %c0_2 = arith.constant 0 : index
    %1 = vector.load %arg2[%c0_1, %c0_2] : memref<32x128xbf16, #tpu.memory_space<vmem>>, vector<32x128xbf16>
    %cst = arith.constant dense<0.000000e+00> : vector<16x128xf32>
    %2 = tpu.matmul %0, %1, %cst {dimension_numbers = #tpu.dot_dimension_numbers<[1], [0], [0], [1], [0, 0, 1, 1], [], []>} : vector<16x32xbf16>, vector<32x128xbf16>, vector<16x128xf32> -> vector<16x128xf32>
    %3 = arith.truncf %2 : vector<16x128xf32> to vector<16x128xbf16>
    %c0_3 = arith.constant 0 : index
    %c0_4 = arith.constant 0 : index
    %4 = vector.load %arg3[%c0_3, %c0_4] : memref<16x128xbf16, #tpu.memory_space<vmem>>, vector<16x128xbf16>
    tpu.vector_store %arg3[%c0_3, %c0_4], %3 {strides = array<i32>} : memref<16x128xbf16, #tpu.memory_space<vmem>>, vector<16x128xbf16>,
    return
  }
  func.func @transform_0(%arg0: i32) -> (i32, i32) {
    %c0_i32 = arith.constant 0 : i32
    %c0_i32_0 = arith.constant 0 : i32
    return %arg0, %c0_i32 : i32, i32
  }
  func.func @transform_1(%arg0: i32) -> (i32, i32) {
    %c0_i32 = arith.constant 0 : i32
    %c0_i32_0 = arith.constant 0 : i32
    %c0_i32_1 = arith.constant 0 : i32
    return %c0_i32, %c0_i32_0 : i32, i32
  }
  func.func @transform_2(%arg0: i32) -> (i32, i32) {
    %c0_i32 = arith.constant 0 : i32
    %c0_i32_0 = arith.constant 0 : i32
    return %arg0, %c0_i32 : i32, i32
  }
}

</mosaic_0001>

<bundles_post_ra>
// kernel: tpu_custom_call.1
= control target key start
LH: loop header
LB: loop body
LE: loop exit
PB: predicated region body
PF: predicated region fallthrough
CT: control target
= control target key end

     0   :  { %7 = vsyncpa [#allocation3], 0  ;;  %s310_s0 = inlined_call_operand.hbm [shape: bf16[16,32], index: 0, kind: input, shape index: {}]   ;;  %s311_s1 = inlined_call_operand.hbm [shape: bf16[32,128], index: 1, kind: input, shape index: {}]   ;;  %s312_s2 = inlined_call_operand.hbm [shape: bf16[16,128], index: 2, kind: output, shape index: {}]  }
   0x1   :  { %8 = vsyncpa [#allocation6], 0 }
   0x2   :  { %9 = vsyncpa [#allocation4], 0  ;;  %s243_s9 = smov [#allocation2]   ;;  %s171_s13 = scalar_lea.hbm %s310_s0, 128 }
   0x3   :  { %s15_s10 = sshll.u32 %s243_s9, 4  ;;  %p172_p0 = scmp.ne.s32.totalorder %s310_s0, %s171_s13  ;;  %s16_s10 = int_to_ptr.vmem [resolvable:$true] %s15_s10 }
   0x4   :  { %p175_p1 = scmp.lt.u32.totalorder %s171_s13, %s310_s0 }
   0x6   :  { %p177_p2 = pnand %p175_p1, %p172_p0 }
   0x8   :  { %180 = shalt.err (!%p177_p2)
}
   0x9   :  { %s181_s18 = scalar_lea.vmem %s16_s10, 128  ;;  %p186_p4 = scmp.lt.s32.totalorder %s16_s10, %s16_s10 }
   0xa   :  { %p182_p3 = scmp.ne.s32.totalorder %s16_s10, %s181_s18  ;;  %p187_p5 = scmp.lt.s32.totalorder %s181_s18, %s181_s18 }
   0xc   :  { %p188_p6 = por %p187_p5, %p186_p4 }
   0xe   :  { %p189_p7 = pnand %p188_p6, %p182_p3 }
  0x10   :  { %192 = shalt.err (!%p189_p7)
}
  0x11   :  { %s244_s19 = smov 64   ;;  %s245_s20 = smov 4  }
  0x12   :  { %21 = dma.hbm_to_vmem [thread:$0]  %s310_s0, 128, %s16_s10, [#allocation3], %s244_s19, %s244_s19, %s245_s20  }
  0x13   :  { %s246_s23 = smov [#allocation5]   ;;  %s193_s27 = scalar_lea.hbm %s311_s1, 256 }
  0x14   :  { %s27_s24 = sshll.u32 %s246_s23, 4  ;;  %p194_p8 = scmp.ne.s32.totalorder %s311_s1, %s193_s27  ;;  %s28_s24 = int_to_ptr.vmem [resolvable:$true] %s27_s24 }
  0x15   :  { %p197_p9 = scmp.lt.u32.totalorder %s193_s27, %s311_s1 }
  0x17   :  { %p199_p10 = pnand %p197_p9, %p194_p8 }
  0x19   :  { %202 = shalt.err (!%p199_p10)
}
  0x1a   :  { %s203_s4 = scalar_lea.vmem %s28_s24, 256  ;;  %p208_p12 = scmp.lt.s32.totalorder %s28_s24, %s28_s24 }
  0x1b   :  { %p204_p11 = scmp.ne.s32.totalorder %s28_s24, %s203_s4  ;;  %p209_p13 = scmp.lt.s32.totalorder %s203_s4, %s203_s4 }
  0x1d   :  { %p210_p0 = por %p209_p13, %p208_p12 }
  0x1f   :  { %p211_p1 = pnand %p210_p0, %p204_p11 }
  0x21   :  { %214 = shalt.err (!%p211_p1)
}
  0x22   :  { %33 = dma.hbm_to_vmem [thread:$0]  %s311_s1, 256, %s28_s24, [#allocation6], %s244_s19, %s244_s19, %s245_s20  }
  0x23   :  { %237 = dma.done.wait [#allocation3], 128  }
  0x24   :  { %238 = vsyncadd [#allocation3], 4294967168 }
  0x25   :  { %239 = dma.done.wait [#allocation6], 256  }
  0x26   :  { %240 = vsyncadd [#allocation6], 4294967040  ;;  %v247_v0 = vmov 0.0   ;;  %vm248_vm0 = vmmov 0   ;;  %v168_v1 = vld [vmem:[#allocation5] sm:$0xff]   ;;  %v169_v2 = vld [vmem:[#allocation5 + $0x8] sm:$0xff]  }
  0x27   :  { %153 = vmatprep.subr.bf16.mxu0 %v247_v0  ;;  %157 = vmatprep.mubr.msk.bf16.mxu0 %vm248_vm0, %v247_v0  ;;  %v170_v3 = vld [vmem:[#allocation2] sm:$0xff]   ;;  %vm64_vm1 = vcmask 261120   ;;  %s249_s6 = smov [#allocation7]  }
  0x28   :  { %154 = vmatpush3.bf16.msra.mxu0 %v168_v1  ;;  %s124_s7 = sshll.u32 %s249_s6, 4  ;;  %s125_s7 = int_to_ptr.vmem [resolvable:$true] %s124_s7 }
  0x29   :  { %155 = vmatprep.subr.bf16.mxu0 %v247_v0  ;;  %s215_s1 = scalar_lea.vmem %s125_s7, 128  ;;  %p220_p3 = scmp.lt.s32.totalorder %s125_s7, %s125_s7 }
  0x2a   :  { %p216_p2 = scmp.ne.s32.totalorder %s125_s7, %s215_s1  ;;  %p221_p4 = scmp.lt.s32.totalorder %s215_s1, %s215_s1 }
  0x2c   :  { %156 = vmatpush3.bf16.msra.mxu0 %v169_v2  ;;  %p222_p5 = por %p221_p4, %p220_p3 }
  0x2e   :  { %p223_p6 = pnand %p222_p5, %p216_p2 }
  0x2f   :  { %158 = vmatmul.mubr.msk.bf16.vlgmr.msra.gmra.mrb[0].mxu0 %vm64_vm1, %v170_v3 }
 0x102   :  { %v102_v4 = vpop.f32.mrb[0].mxu0 }
 0x103   :  { %v159_v5 = vpop.f32.mrb[1].mxu0 }
 0x104   :  { %v105_v6 = vpop.f32.mrb[2].mxu0 }
 0x105   :  { %v148_v7 = vpack.c.bf16 %v105_v6, %v102_v4  ;;  %v160_v8 = vpop.f32.mrb[3].mxu0 }
 0x107   :  { %149 = vst [vmem:[#allocation7] sm:$0xff] %v148_v7  }
 0x108   :  { %226 = shalt.err (!%p223_p6)
}
 0x109   :  { %s227_s10 = scalar_lea.hbm %s312_s2, 128 }
 0x10a   :  { %p228_p7 = scmp.ne.s32.totalorder %s312_s2, %s227_s10  ;;  %p231_p8 = scmp.lt.u32.totalorder %s227_s10, %s312_s2 }
 0x10c   :  { %p233_p9 = pnand %p231_p8, %p228_p7 }
 0x10e   :  { %236 = shalt.err (!%p233_p9)
}
 0x10f   :  { %130 = dma.vmem_to_hbm [thread:$0]  %s125_s7, 128, %s312_s2, [#allocation4], %s244_s19, %s244_s19, %s245_s20  }
 0x110   :  { %241 = dma.done.wait [#allocation4], 128  }
 0x111   :  { %242 = vsyncadd [#allocation4], 4294967168 }
 0x112   :  { %134 = vsyncpa [#allocation3], 1 }
 0x113   :  { %135 = vsyncpa [#allocation6], 1 }
 0x114   :  { %136 = vsyncpa [#allocation4], 1 }

</bundles_post_ra>
